<compile_context>
chip_gen: v5e
topology: v5e:2x2
jax: 0.10.0
libtpu: 0.0.40
codegen_flags: <defaults>
</compile_context>

<pallas_src>
import math

import jax
import jax.numpy as jnp
from jax.experimental import pallas as pl
from jax.experimental.pallas import tpu as pltpu


def _make_kernel(k, two_half_stores):
    """Build the kernel body for a given lane-packing factor k."""

    def kernel(t_ref, tab_ref, out_ref):
        # t_ref  : (TILE, k)  f32   timesteps, k per packed output row
        # tab_ref: (3, W)     f32   rows = [tiled freqs, cos-select, slot index]
        # out_ref: (TILE, W)  out dtype
        t_exp = t_ref[:, 0:1]                                     # (TILE, 1)
        if k > 1:
            slot = tab_ref[2:3, :]                                # (1, W)
            for j in range(1, k):                                 # k <= 8, static unroll
                t_exp = jnp.where(slot == float(j), t_ref[:, j:j + 1], t_exp)

        if two_half_stores:
            # dim % 256 == 0 (and k == 1): both half stores are lane-aligned and
            # unmasked; exactly one transcendental per element (v7x-friendly).
            h = out_ref.shape[-1] // 2
            arg = t_exp * tab_ref[0:1, :h]                        # (TILE, h)
            out_ref[:, :h] = jnp.sin(arg).astype(out_ref.dtype)
            out_ref[:, h:] = jnp.cos(arg).astype(out_ref.dtype)
        else:
            freq = tab_ref[0:1, :]                                # (1, W)
            sel = tab_ref[1:2, :]                                 # 1.0 on the cos half
            arg = t_exp * freq                                    # (TILE, W)
            out_ref[...] = jnp.where(sel > 0.5, jnp.cos(arg), jnp.sin(arg)
                                     ).astype(out_ref.dtype)

    return kernel


def sinusoidal_position_embeddings(time, dim, *, out_dtype=jnp.float32,
                                   tile_bytes=6 * 1024 * 1024):
    """time: (B,) -> (B, dim) = concat(sin(t*f), cos(t*f)), f_i = 1e4^(-i/(half-1))."""
    assert dim % 2 == 0, "dim must be even"
    half = dim // 2
    assert half > 1, "dim must be >= 4 (half_dim - 1 appears as a divisor)"
    B = time.shape[0]
    out_dtype = jnp.dtype(out_dtype)

    # ---- constant frequency / select / slot table (XLA constant-folds it) ----
    scale = math.log(10000.0) / (half - 1)
    freqs = jnp.exp(jnp.arange(half, dtype=jnp.float32) * (-scale))       # (half,)
    freq_row = jnp.concatenate([freqs, freqs])                            # (dim,)
    sel_row = jnp.concatenate([jnp.zeros((half,), jnp.float32),
                               jnp.ones((half,), jnp.float32)])           # (dim,)

    # ---- lane packing: k batch rows per lane row when dim < 128 ----
    k = 1
    if dim < 128 and 128 % dim == 0:
        kk = 128 // dim
        if kk > 1 and B % kk == 0:          # fall back to unpacked (masked) otherwise
            k = kk
    W = k * dim
    rows = B // k

    table = jnp.stack([
        jnp.tile(freq_row, k),                                            # (W,)
        jnp.tile(sel_row, k),                                             # (W,)
        jnp.repeat(jnp.arange(k, dtype=jnp.float32), dim),                # slot index per col
    ])                                                                    # (3, W)

    t2 = time.astype(jnp.float32).reshape(rows, k)                        # packed timesteps

    # ---- batch tile sized by bytes (per output buffer; Pallas double-buffers) ----
    row_bytes = W * out_dtype.itemsize
    cap_rows = max(8, (tile_bytes // row_bytes) // 8 * 8)                 # multiple of 8
    tile_rows = rows if rows <= cap_rows else cap_rows                    # full rows also legal
    grid = (pl.cdiv(rows, tile_rows),)                                    # ragged last block is masked

    two_half_stores = (k == 1) and (dim % 256 == 0)
    kernel = _make_kernel(k, two_half_stores)

    out = pl.pallas_call(
        kernel,
        out_shape=jax.ShapeDtypeStruct((rows, W), out_dtype),
        grid_spec=pltpu.PrefetchScalarGridSpec(
            num_scalar_prefetch=0,
            grid=grid,
            in_specs=[
                pl.BlockSpec((tile_rows, k), lambda i: (i, 0)),   # timestep tile
                pl.BlockSpec((3, W), lambda i: (0, 0)),           # shared constant table
            ],
            out_specs=pl.BlockSpec((tile_rows, W), lambda i: (i, 0)),
        ),
        compiler_params=pltpu.CompilerParams(
            dimension_semantics=("parallel",),
        ),
    )(t2, table)

    # (rows, k*dim) -> (B, dim) is a contiguous row-major reshape: no copy, no slice.
    return out.reshape(B, dim)


def _reference(time, dim):
    half = dim // 2
    emb = math.log(10000.0) / (half - 1)
    emb = jnp.exp(jnp.arange(half, dtype=jnp.float32) * -emb)
    emb = time.astype(jnp.float32)[:, None] * emb[None, :]
    return jnp.concatenate([jnp.sin(emb), jnp.cos(emb)], axis=-1)


if __name__ == "__main__":
    key = jax.random.PRNGKey(0)
    B, dim = 8, 32
    # Diffusion-style timesteps.
    time = jax.random.uniform(key, (B,), dtype=jnp.float32, minval=0.0, maxval=1000.0)

    out = sinusoidal_position_embeddings(time, dim)   # exercises the lane-packed path (k=4)
    out = jax.block_until_ready(out)

    ref = _reference(time, dim)
    assert out.shape == (B, dim)
    assert out.dtype == jnp.float32
    # Arguments t*f are computed exactly (no phase-add rounding anymore); the
    # residual difference is only sin/cos implementation ulps (Mosaic vs XLA).
    assert jnp.allclose(out, ref, atol=2e-4, rtol=1e-5), "mismatch vs reference"
    print("KERNEL_OK")
</pallas_src>

<mosaic_0001>
module attributes {stable_mosaic.version = 11 : i64} {
  func.func @kernel(%arg0: i32, %arg1: memref<2x4xf32, #tpu.memory_space<vmem>>, %arg2: memref<3x128xf32, #tpu.memory_space<vmem>>, %arg3: memref<2x128xf32, #tpu.memory_space<vmem>>) attributes {dimension_semantics = [#tpu.dimension_semantics<parallel>], iteration_bounds = array<i64: 1>, scalar_prefetch = 0 : i64, scratch_operands = 0 : i64, tpu.core_type = #tpu.core_type<tc>, window_params = [{transform_indices = @transform_0, window_bounds = array<i64: 2, 4>}, {pipeline_mode = #tpu.pipeline_mode<synchronous>, transform_indices = @transform_1, window_bounds = array<i64: 3, 128>}, {transform_indices = @transform_2, window_bounds = array<i64: 2, 128>}]} {
    %c0 = arith.constant 0 : index
    %c0_0 = arith.constant 0 : index
    %0 = vector.load %arg1[%c0, %c0_0] : memref<2x4xf32, #tpu.memory_space<vmem>>, vector<2x1xf32>
    %c2 = arith.constant 2 : index
    %c0_1 = arith.constant 0 : index
    %1 = vector.load %arg2[%c2, %c0_1] : memref<3x128xf32, #tpu.memory_space<vmem>>, vector<1x128xf32>
    %cst = arith.constant 1.000000e+00 : f32
    %2 = vector.broadcast %cst : f32 to vector<1x128xf32>
    %3 = arith.cmpf oeq, %1, %2 : vector<1x128xf32>
    %c0_2 = arith.constant 0 : index
    %c1 = arith.constant 1 : index
    %4 = vector.load %arg1[%c0_2, %c1] : memref<2x4xf32, #tpu.memory_space<vmem>>, vector<2x1xf32>
    %5 = vector.shape_cast %3 : vector<1x128xi1> to vector<1x128xi1>
    %6 = vector.broadcast %5 : vector<1x128xi1> to vector<2x128xi1>
    %7 = vector.shape_cast %4 : vector<2x1xf32> to vector<2x1xf32>
    %8 = vector.broadcast %7 : vector<2x1xf32> to vector<2x128xf32>
    %9 = vector.shape_cast %0 : vector<2x1xf32> to vector<2x1xf32>
    %10 = vector.broadcast %9 : vector<2x1xf32> to vector<2x128xf32>
    %11 = arith.select %6, %8, %10 : vector<2x128xi1>, vector<2x128xf32>
    %cst_3 = arith.constant 2.000000e+00 : f32
    %12 = vector.broadcast %cst_3 : f32 to vector<1x128xf32>
    %13 = arith.cmpf oeq, %1, %12 : vector<1x128xf32>
    %c0_4 = arith.constant 0 : index
    %c2_5 = arith.constant 2 : index
    %14 = vector.load %arg1[%c0_4, %c2_5] : memref<2x4xf32, #tpu.memory_space<vmem>>, vector<2x1xf32>
    %15 = vector.shape_cast %13 : vector<1x128xi1> to vector<1x128xi1>
    %16 = vector.broadcast %15 : vector<1x128xi1> to vector<2x128xi1>
    %17 = vector.shape_cast %14 : vector<2x1xf32> to vector<2x1xf32>
    %18 = vector.broadcast %17 : vector<2x1xf32> to vector<2x128xf32>
    %19 = arith.select %16, %18, %11 : vector<2x128xi1>, vector<2x128xf32>
    %cst_6 = arith.constant 3.000000e+00 : f32
    %20 = vector.broadcast %cst_6 : f32 to vector<1x128xf32>
    %21 = arith.cmpf oeq, %1, %20 : vector<1x128xf32>
    %c0_7 = arith.constant 0 : index
    %c3 = arith.constant 3 : index
    %22 = vector.load %arg1[%c0_7, %c3] : memref<2x4xf32, #tpu.memory_space<vmem>>, vector<2x1xf32>
    %23 = vector.shape_cast %21 : vector<1x128xi1> to vector<1x128xi1>
    %24 = vector.broadcast %23 : vector<1x128xi1> to vector<2x128xi1>
    %25 = vector.shape_cast %22 : vector<2x1xf32> to vector<2x1xf32>
    %26 = vector.broadcast %25 : vector<2x1xf32> to vector<2x128xf32>
    %27 = arith.select %24, %26, %19 : vector<2x128xi1>, vector<2x128xf32>
    %c0_8 = arith.constant 0 : index
    %c0_9 = arith.constant 0 : index
    %28 = vector.load %arg2[%c0_8, %c0_9] : memref<3x128xf32, #tpu.memory_space<vmem>>, vector<1x128xf32>
    %c1_10 = arith.constant 1 : index
    %c0_11 = arith.constant 0 : index
    %29 = vector.load %arg2[%c1_10, %c0_11] : memref<3x128xf32, #tpu.memory_space<vmem>>, vector<1x128xf32>
    %30 = vector.broadcast %28 : vector<1x128xf32> to vector<2x128xf32>
    %31 = arith.mulf %27, %30 : vector<2x128xf32>
    %cst_12 = arith.constant 5.000000e-01 : f32
    %32 = vector.broadcast %cst_12 : f32 to vector<1x128xf32>
    %33 = arith.cmpf ogt, %29, %32 : vector<1x128xf32>
    %34 = math.cos %31 : vector<2x128xf32>
    %35 = math.sin %31 : vector<2x128xf32>
    %36 = vector.shape_cast %33 : vector<1x128xi1> to vector<1x128xi1>
    %37 = vector.broadcast %36 : vector<1x128xi1> to vector<2x128xi1>
    %38 = arith.select %37, %34, %35 : vector<2x128xi1>, vector<2x128xf32>
    %c0_13 = arith.constant 0 : index
    %c0_14 = arith.constant 0 : index
    %39 = vector.load %arg3[%c0_13, %c0_14] : memref<2x128xf32, #tpu.memory_space<vmem>>, vector<2x128xf32>
    tpu.vector_store %arg3[%c0_13, %c0_14], %38 {strides = array<i32>} : memref<2x128xf32, #tpu.memory_space<vmem>>, vector<2x128xf32>,
    return
  }
  func.func @transform_0(%arg0: i32) -> (i32, i32) {
    %c0_i32 = arith.constant 0 : i32
    %c0_i32_0 = arith.constant 0 : i32
    return %arg0, %c0_i32 : i32, i32
  }
  func.func @transform_1(%arg0: i32) -> (i32, i32) {
    %c0_i32 = arith.constant 0 : i32
    %c0_i32_0 = arith.constant 0 : i32
    %c0_i32_1 = arith.constant 0 : i32
    return %c0_i32, %c0_i32_0 : i32, i32
  }
  func.func @transform_2(%arg0: i32) -> (i32, i32) {
    %c0_i32 = arith.constant 0 : i32
    %c0_i32_0 = arith.constant 0 : i32
    return %arg0, %c0_i32 : i32, i32
  }
}

</mosaic_0001>

<bundles_post_ra>
// kernel: tpu_custom_call.1
= control target key start
LH: loop header
LB: loop body
LE: loop exit
PB: predicated region body
PF: predicated region fallthrough
CT: control target
= control target key end

     0   :  { %7 = vsyncpa [#allocation3], 0  ;;  %s623_s0 = inlined_call_operand.hbm [shape: f32[2,4], index: 0, kind: input, shape index: {}]   ;;  %s624_s1 = inlined_call_operand.hbm [shape: f32[3,128], index: 1, kind: input, shape index: {}]   ;;  %s625_s2 = inlined_call_operand.hbm [shape: f32[2,128], index: 2, kind: output, shape index: {}]  }
   0x1   :  { %8 = vsyncpa [#allocation6], 0 }
   0x2   :  { %9 = vsyncpa [#allocation4], 0  ;;  %s15_s11 = sshll.u32 %s623_s0, 4  ;;  %s514_s12 = smov [#allocation2]   ;;  %s16_s11 = int_to_ptr.hbm [resolvable:$true] %s15_s11 }
   0x3   :  { %s17_s13 = sshll.u32 %s514_s12, 4  ;;  %s26_s16 = sshll.u32 %s624_s1, 4  ;;  %s18_s13 = int_to_ptr.vmem [resolvable:$true] %s17_s13  ;;  %s27_s16 = int_to_ptr.hbm [resolvable:$true] %s26_s16 }
   0x4   :  { %20 = dma.hbm_to_vmem [thread:$0]  %s16_s11, 32, %s18_s13, [#allocation3]  }
   0x5   :  { %s515_s17 = smov [#allocation5]  }
   0x6   :  { %s28_s18 = sshll.u32 %s515_s17, 4  ;;  %s29_s18 = int_to_ptr.vmem [resolvable:$true] %s28_s18 }
   0x7   :  { %31 = dma.hbm_to_vmem [thread:$0]  %s27_s16, 64, %s29_s18, [#allocation6]  }
   0x8   :  { %508 = dma.done.wait [#allocation3], 32  }
   0x9   :  { %509 = vsyncadd [#allocation3], 4294967264 }
   0xa   :  { %510 = dma.done.wait [#allocation6], 64  }
   0xb   :  { %511 = vsyncadd [#allocation6], 4294967232  ;;  %v516_v0 = vmov 1   ;;  %v517_v1 = vmov 2   ;;  %v40_v2 = vld [vmem:[#allocation2] sm:$0x3] }
   0xc   :  { %430 = vset.pattern.permute.xlu0 %v516_v0  ;;  %432 = vset.pattern.permute.xlu1 %v517_v1  ;;  %v518_v3 = vmov 0   ;;  %v519_v4 = vmov 3   ;;  %v41_v5 = vld [vmem:[#allocation5 + $0x2] sm:$0x1]  ;;  %v435_v15 = vld [vmem:[#allocation5] ss:$0 sm:$0xff] }
   0xd   :  { %48 = vperm.xlu0 %430, %v40_v2   ;;  %61 = vperm.xlu1 %432, %v40_v2   ;;  %vm42_vm0 = vcmp.eq.f32.partialorder %v41_v5, 1.0  ;;  %vm56_vm1 = vcmp.eq.f32.partialorder %v41_v5, 2.0  ;;  %vm65_vm2 = vcmp.eq.f32.partialorder %v41_v5, 3.0  ;;  %v520_v32 = vmov 683565275   ;;  %s526_s0 = smov [#allocation7]  }
   0xe   :  { %v43_v8 = vsel %vm42_vm0, 1, %v518_v3  ;;  %v57_v9 = vsel %vm56_vm1, 1, %v518_v3  ;;  %v66_v10 = vsel %vm65_vm2, 1, %v518_v3  ;;  %v521_v34 = vmov 2475754826   ;;  %s398_s1 = sshll.u32 %s526_s0, 4  ;;  %s399_s1 = int_to_ptr.vmem [resolvable:$true] %s398_s1 }
   0xf   :  { %v44_v11 = vperm.slane %v43_v8, 0  ;;  %v58_v12 = vperm.slane %v57_v9, 0  ;;  %v67_v13 = vperm.slane %v66_v10, 0  ;;  %v522_v37 = vmov 2131351028   ;;  %s400_s21 = sshll.u32 %s625_s2, 4  ;;  %s401_s21 = int_to_ptr.hbm [resolvable:$true] %s400_s21 }
  0x10   :  { %v523_v40 = vmov 2102212464   ;;  %v524_v43 = vmov 920167782   ;;  %v525_v46 = vmov 1326507024  }
  0x11   :  { %vm45_vm3 = vcmp.eq.s32.totalorder %v44_v11, 1  ;;  %vm59_vm4 = vcmp.eq.s32.totalorder %v58_v12, 1  ;;  %vm68_vm5 = vcmp.eq.s32.totalorder %v67_v13, 1 }
  0x15   :  { %431 = vset.pattern.permute.xlu0 %v518_v3  ;;  %433 = vset.pattern.permute.xlu1 %v519_v4 }
  0x16   :  { %52 = vperm.xlu0 %431, %v40_v2   ;;  %70 = vperm.xlu1 %433, %v40_v2  }
  0x1e   :  { %434 = vset.pattern.permute.xlu0 %v519_v4 }
  0x7f   :  { %v49_v6 = vpop.permute.xlu0 %48  ;;  %v62_v7 = vpop.permute.xlu1 %61 }
  0x88   :  { %v53_v14 = vpop.permute.xlu0 %52  ;;  %v71_v16 = vpop.permute.xlu1 %70 }
  0x89   :  { %v55_v17 = vsel %vm45_vm3, %v49_v6, %v53_v14 }
  0x8a   :  { %v64_v18 = vsel %vm59_vm4, %v62_v7, %v55_v17 }
  0x8b   :  { %v73_v19 = vsel %vm68_vm5, %v71_v16, %v64_v18 }
  0x8c   :  { %v552_v20 = vmul.f32 %v435_v15, %v73_v19 }
  0x8e   :  { %v82_v21 = vand.u32 2139095040, %v552_v20  ;;  %v79_v24 = vand.u32 2147483647, %v552_v20  ;;  %vm81_vm2 = vcmp.lt.s32.totalorder %v552_v20, 0 }
  0x90   :  { %v83_v22 = vshrl.u32 %v82_v21, 23  ;;  %v86_v26 = vand.u32 8388607, %v79_v24  ;;  %vm80_vm3 = vcmp.le.f32.partialorder %v79_v24, 0.7853982 }
  0x92   :  { %v411_v23 = vadd.s32 4294967169, %v83_v22  ;;  %v87_v30 = vor.u32 8388608, %v86_v26 }
  0x94   :  { %v89_v25 = vadd.s32 1, %v411_v23  ;;  %v569_v53 = vshll.u32 %v87_v30, 8 }
  0x96   :  { %vm90_vm6 = vcmp.gt.s32.totalorder %v89_v25, 0  ;;  %v128_v62 = vand.u32 65535, %v569_v53  ;;  %v129_v63 = vshrl.u32 %v569_v53, 16 }
  0x97   :  { %v91_v27 = vsel %vm90_vm6, %v89_v25, 0 }
  0x98   :  { %v93_v28 = vand.u32 31, %v91_v27  ;;  %v560_v31 = vshrl.u32 %v91_v27, 5 }
  0x9a   :  { %v558_v29 = vsub.s32 32, %v93_v28  ;;  %v96_v33 = vshll.u32 %v520_v32, %v93_v28  ;;  %v99_v35 = vshll.u32 %v521_v34, %v93_v28  ;;  %v102_v39 = vshll.u32 %v522_v37, %v93_v28 }
  0x9b   :  { %v105_v42 = vshll.u32 %v523_v40, %v93_v28  ;;  %v108_v45 = vshll.u32 %v524_v43, %v93_v28  ;;  %vm111_vm7 = vcmp.lt.s32.totalorder %v560_v31, 1  ;;  %vm114_vm8 = vcmp.lt.s32.totalorder %v560_v31, 4 }
  0x9c   :  { %v97_v36 = vshrl.u32 %v521_v34, %v558_v29  ;;  %v100_v38 = vshrl.u32 %v522_v37, %v558_v29  ;;  %v103_v41 = vshrl.u32 %v523_v40, %v558_v29  ;;  %v106_v44 = vshrl.u32 %v524_v43, %v558_v29 }
  0x9d   :  { %v109_v47 = vshrl.u32 %v525_v46, %v558_v29  ;;  %vm113_vm9 = vcmp.lt.s32.totalorder %v560_v31, 3  ;;  %vm112_vm10 = vcmp.lt.s32.totalorder %v560_v31, 2  ;;  %v95_v27 = vshrl.u32 %v520_v32, %v558_v29 }
  0x9e   :  { %v98_v48 = vor.u32 %v97_v36, %v96_v33  ;;  %v101_v49 = vor.u32 %v100_v38, %v99_v35  ;;  %v104_v50 = vor.u32 %v103_v41, %v102_v39  ;;  %v107_v51 = vor.u32 %v106_v44, %v105_v42 }
  0x9f   :  { %v110_v52 = vor.u32 %v109_v47, %v108_v45 }
  0xa0   :  { %v119_v54 = vsel %vm111_vm7, %v98_v48, %v101_v49  ;;  %v123_v55 = vsel %vm111_vm7, %v101_v49, %v104_v50  ;;  %v120_v56 = vsel %vm114_vm8, %v107_v51, 920167782  ;;  %v116_v23 = vsel %vm114_vm8, %v104_v50, 2102212464 }
  0xa1   :  { %v124_v57 = vsel %vm114_vm8, %v110_v52, 1326507024  ;;  %v121_v58 = vsel %vm113_vm9, %v104_v50, %v120_v56  ;;  %v115_v36 = vsel %vm111_vm7, %v95_v27, %v98_v48  ;;  %v117_v37 = vsel %vm113_vm9, %v101_v49, %v116_v23 }
  0xa2   :  { %v125_v59 = vsel %vm113_vm9, %v107_v51, %v124_v57  ;;  %v122_v60 = vsel %vm112_vm10, %v119_v54, %v121_v58  ;;  %v118_v29 = vsel %vm112_vm10, %v115_v36, %v117_v37 }
  0xa3   :  { %v126_v61 = vsel %vm112_vm10, %v123_v55, %v125_v59  ;;  %v152_v2 = vand.u32 65535, %v122_v60  ;;  %v153_v4 = vshrl.u32 %v122_v60, 16  ;;  %v172_v45 = vmul.u32 %v569_v53, %v118_v29 }
  0xa4   :  { %v130_v0 = vand.u32 65535, %v126_v61  ;;  %v131_v1 = vshrl.u32 %v126_v61, 16 }
  0xa5   :  { %v155_v7 = vmul.u32 %v153_v4, %v128_v62  ;;  %v156_v8 = vmul.u32 %v152_v2, %v129_v63  ;;  %v154_v12 = vmul.u32 %v152_v2, %v128_v62  ;;  %v157_v16 = vmul.u32 %v153_v4, %v129_v63 }
  0xa6   :  { %v133_v5 = vmul.u32 %v131_v1, %v128_v62  ;;  %v134_v6 = vmul.u32 %v130_v0, %v129_v63  ;;  %v132_v9 = vmul.u32 %v130_v0, %v128_v62  ;;  %v135_v11 = vmul.u32 %v131_v1, %v129_v63 }
  0xa7   :  { %v158_v13 = vshll.u32 %v155_v7, 16  ;;  %v160_v18 = vshll.u32 %v156_v8, 16  ;;  %v159_v34 = vshrl.u32 %v155_v7, 16  ;;  %v161_v40 = vshrl.u32 %v156_v8, 16 }
  0xa8   :  { %v136_v10 = vshll.u32 %v133_v5, 16  ;;  %v138_v14 = vshll.u32 %v134_v6, 16  ;;  %v137_v28 = vshrl.u32 %v133_v5, 16  ;;  %v139_v38 = vshrl.u32 %v134_v6, 16 }
  0xa9   :  { %vm162_vm12 = vc.u32 %v154_v12, %v158_v13  ;;  %v164_v19 = vadd.s32 %v158_v13, %v154_v12  ;;  %v75_v13 = vld [vmem:[#allocation5 + $0x1] sm:$0x1] }
  0xaa   :  { %vm140_vm11 = vc.u32 %v132_v9, %v136_v10  ;;  %v142_v15 = vadd.s32 %v136_v10, %v132_v9  ;;  %v163_v22 = vsel %vm162_vm12, 1, %v518_v3  ;;  %vm78_vm4 = vcmp.gt.f32.partialorder %v75_v13, 0.5 }
  0xab   :  { %v141_v17 = vsel %vm140_vm11, 1, %v518_v3  ;;  %v165_v26 = vadd.s32 %v163_v22, %v157_v16  ;;  %vm166_vm14 = vc.u32 %v164_v19, %v160_v18  ;;  %v168_v43 = vadd.s32 %v164_v19, %v160_v18 }
  0xac   :  { %v143_v21 = vadd.s32 %v141_v17, %v135_v11  ;;  %vm144_vm13 = vc.u32 %v142_v15, %v138_v14  ;;  %v167_v33 = vsel %vm166_vm14, 1, %v518_v3  ;;  %vm222_vm12 = vweird.f32 %v552_v20 }
  0xad   :  { %v145_v25 = vsel %vm144_vm13, 1, %v518_v3  ;;  %v169_v35 = vadd.s32 %v167_v33, %v165_v26 }
  0xae   :  { %v147_v30 = vadd.s32 %v145_v25, %v143_v21  ;;  %v388_v25 = vsel %vm78_vm4, 1, %v518_v3 }
  0xaf   :  { %v170_v41 = vadd.s32 %v169_v35, %v159_v34  ;;  %v389_v33 = vperm.slane %v388_v25, 0 }
  0xb0   :  { %v148_v39 = vadd.s32 %v147_v30, %v137_v28 }
  0xb1   :  { %v171_v32 = vadd.s32 %v170_v41, %v161_v40  ;;  %vm612_vm11 = vcmp.eq.s32.totalorder %v389_v33, 1 }
  0xb2   :  { %v149_v42 = vadd.s32 %v148_v39, %v139_v38 }
  0xb3   :  { %v175_v44 = vadd.s32 1, %v171_v32 }
  0xb4   :  { %vm174_vm15 = vc.u32 %v149_v42, %v168_v43  ;;  %v173_v31 = vadd.s32 %v168_v43, %v149_v42 }
  0xb5   :  { %v176_v46 = vsel %vm174_vm15, %v175_v44, %v171_v32 }
  0xb6   :  { %v177_v47 = vadd.s32 %v176_v46, %v172_v45 }
  0xb8   :  { %v178_v48 = vadd.s32 536870912, %v177_v47 }
  0xba   :  { %v179_v50 = vshrl.u32 %v178_v48, 30 }
  0xbc   :  { %v180_v51 = vshll.u32 %v179_v50, 30  ;;  %v203_v8 = vsub.s32 4, %v179_v50 }
  0xbe   :  { %v181_v49 = vsub.s32 %v177_v47, %v180_v51  ;;  %v204_v12 = vsel %vm81_vm2, %v203_v8, %v179_v50 }
  0xbf   :  { %v206_v16 = vsel %vm80_vm3, 0, %v204_v12 }
  0xc0   :  { %vm182_vm0 = vcmp.lt.s32.totalorder %v181_v49, 0  ;;  %v183_v52 = vsub.s32 0, %v181_v49  ;;  %v377_v22 = vadd.s32 3, %v206_v16  ;;  %v223_v28 = vand.u32 3, %v206_v16 }
  0xc2   :  { %v184_v54 = vsel %vm182_vm0, %v183_v52, %v181_v49  ;;  %v378_v30 = vand.u32 3, %v377_v22  ;;  %vm224_vm5 = vcmp.lt.s32.totalorder %v223_v28, 2  ;;  %vm225_vm6 = vcmp.eq.s32.totalorder %v223_v28, 0 }
  0xc3   :  { %v185_v55 = vclz %v184_v54  ;;  %vm228_vm7 = vcmp.eq.s32.totalorder %v223_v28, 2 }
  0xc4   :  { %vm379_vm8 = vcmp.lt.s32.totalorder %v378_v30, 2  ;;  %vm380_vm9 = vcmp.eq.s32.totalorder %v378_v30, 0  ;;  %vm383_vm10 = vcmp.eq.s32.totalorder %v378_v30, 2 }
  0xc5   :  { %v412_v56 = vadd.s32 4294967294, %v185_v55 }
  0xc7   :  { %vm413_vm1 = vcmp.lt.s32.totalorder %v412_v56, 0 }
  0xc8   :  { %v188_v57 = vsel %vm413_vm1, 0, %v412_v56 }
  0xc9   :  { %v189_v58 = vsub.s32 32, %v188_v57  ;;  %v193_v59 = vsub.s32 4294967266, %v188_v57  ;;  %v190_v60 = vshll.u32 %v181_v49, %v188_v57 }
  0xcb   :  { %v191_v61 = vshrl.u32 %v173_v31, %v189_v58  ;;  %v194_v62 = vadd.s32 127, %v193_v59 }
  0xcd   :  { %v192_v53 = vor.u32 %v191_v61, %v190_v60  ;;  %v195_v63 = vshll.u32 %v194_v62, 23 }
  0xcf   :  { %v196_v0 = vor.u32 4788187, %v195_v63  ;;  %v199_v2 = vcvt.s32.f32 %v192_v53 }
  0xd1   :  { %v197_v1 = vand.u32 2147483647, %v196_v0 }
  0xd3   :  { %v200_v4 = vmul.f32 %v199_v2, %v197_v1 }
  0xd5   :  { %v201_v5 = vxor.u32 2147483648, %v200_v4 }
  0xd7   :  { %v202_v6 = vsel %vm81_vm2, %v201_v5, %v200_v4 }
  0xd8   :  { %v205_v7 = vsel %vm80_vm3, %v552_v20, %v202_v6 }
  0xd9   :  { %v207_v9 = vmul.f32 %v205_v7, %v205_v7 }
  0xdb   :  { %v208_v10 = vmul.f32 -0.001358992, %v207_v9  ;;  %v215_v11 = vmul.f32 -0.00019511016, %v207_v9 }
  0xdd   :  { %v209_v14 = vadd.f32 0.041655596, %v208_v10  ;;  %v216_v15 = vadd.f32 0.008332121, %v215_v11 }
  0xdf   :  { %v210_v17 = vmul.f32 %v209_v14, %v207_v9  ;;  %v217_v18 = vmul.f32 %v216_v15, %v207_v9 }
  0xe1   :  { %v211_v19 = vadd.f32 -0.4999988, %v210_v17  ;;  %v218_v21 = vadd.f32 -0.16666654, %v217_v18 }
  0xe3   :  { %v212_v23 = vmul.f32 %v211_v19, %v207_v9  ;;  %v219_v24 = vmul.f32 %v218_v21, %v207_v9 }
  0xe5   :  { %v213_v26 = vadd.f32 1.0, %v212_v23  ;;  %v220_v27 = vadd.f32 1.0, %v219_v24 }
  0xe7   :  { %v221_v34 = vmul.f32 %v220_v27, %v205_v7  ;;  %v229_v35 = vxor.u32 2147483648, %v213_v26 }
  0xe9   :  { %v226_v36 = vxor.u32 2147483648, %v221_v34  ;;  %v230_v38 = vsel %vm228_vm7, %v229_v35, %v221_v34  ;;  %v385_v40 = vsel %vm383_vm10, %v229_v35, %v221_v34 }
  0xeb   :  { %v227_v3 = vsel %vm225_vm6, %v213_v26, %v226_v36  ;;  %v382_v39 = vsel %vm380_vm9, %v213_v26, %v226_v36 }
  0xec   :  { %v231_v41 = vsel %vm224_vm5, %v227_v3, %v230_v38  ;;  %v386_v42 = vsel %vm379_vm8, %v382_v39, %v385_v40 }
  0xed   :  { %v232_v43 = vsel %vm222_vm12, nan, %v231_v41  ;;  %v387_v29 = vsel %vm222_vm12, nan, %v386_v42 }
  0xee   :  { %v391_v32 = vsel %vm612_vm11, %v232_v43, %v387_v29 }
  0xef   :  { %392 = vst [vmem:[#allocation7] sm:$0x3] %v391_v32 }
  0xf0   :  { %403 = dma.vmem_to_hbm [thread:$0]  %s399_s1, 32, %s401_s21, [#allocation4]  }
  0xf1   :  { %512 = dma.done.wait [#allocation4], 32  }
  0xf2   :  { %513 = vsyncadd [#allocation4], 4294967264 }
  0xf3   :  { %408 = vsyncpa [#allocation3], 1 }
  0xf4   :  { %409 = vsyncpa [#allocation6], 1 }
  0xf5   :  { %410 = vsyncpa [#allocation4], 1 }

</bundles_post_ra>
